<compile_context>
chip_gen: v6e
topology: v6e:2x2x1
jax: 0.10.0
libtpu: 0.0.40
codegen_flags: <defaults>
</compile_context>

<pallas_src>
import functools

import jax
import jax.numpy as jnp
from jax import lax
from jax.experimental import pallas as pl
from jax.experimental.pallas import tpu as pltpu


def _round_up(x, m):
    return (x + m - 1) // m * m


def _seq_tiling(total_seq, batch):
    """(tile, padded_len) for the token axis (prefix + patches)."""
    if batch >= 2:
        if total_seq <= 512:
            # One full-length block: no seq padding, no trailing slice copy
            # (block dim == full array dim, so the (8,...) rule does not bite).
            return total_seq, total_seq
        return 256, _round_up(total_seq, 256)
    # batch == 1: guarantee >= 2 parallel grid iterations so both v7x
    # TensorCores get work (no effect on single-core v5e/v6e).
    if total_seq <= 512:
        s_pad = _round_up(total_seq, 16)
        return s_pad // 2, s_pad
    return 256, _round_up(total_seq, 256)


def _choose_tn(n_pad, k_pad, t_s, out_itemsize, masked):
    """Largest lane tile (multiple of 128, divisor of n_pad) under a VMEM budget.

    Ideally tn == n_pad: weight / bias / pos blocks then stay resident for the
    whole kernel and are DMA'd exactly once.
    """
    def footprint(tn):
        w = k_pad * tn * 2                         # bf16 weight
        bias = tn * 4
        pos = t_s * tn * 4
        x = t_s * k_pad * 2                        # bf16 patches
        out = t_s * tn * out_itemsize
        extra = (t_s * 4 + tn * 4) if masked else 0
        return 2 * (w + bias + pos + x + out + extra)   # double-buffered

    budget = 40 * 1024 * 1024   # conservative: fits v7x's 64 MiB with headroom
    for tn in range(n_pad, 0, -128):
        if n_pad % tn == 0 and footprint(tn) <= budget:
            return tn, footprint(tn)
    return 128, footprint(128)


def _embed_kernel(x_ref, w_ref, b_ref, pos_ref, o_ref):
    # x_ref: (1, tS, Kp) bf16   w_ref: (Kp, tn) bf16   b_ref: (1, tn) f32
    # pos_ref: (tS, tn) f32 (prefix rows carry token + pos - bias)
    acc = jnp.dot(x_ref[0], w_ref[...], preferred_element_type=jnp.float32)
    o_ref[0] = (acc + b_ref[...] + pos_ref[...]).astype(o_ref.dtype)


def _embed_kernel_masked(x_ref, w_ref, b_ref, mask_ref, mtok_ref, pos_ref, o_ref):
    acc = jnp.dot(x_ref[0], w_ref[...], preferred_element_type=jnp.float32)
    emb = acc + b_ref[...]
    m = mask_ref[0]                               # (tS, 1) in {0, 1}
    emb = emb * (1.0 - m) + mtok_ref[...] * m     # mask-token replacement
    o_ref[0] = (emb + pos_ref[...]).astype(o_ref.dtype)


def prepare_vit_embedding_params(conv_weight, conv_bias, cls_token,
                                 position_embeddings, global_tokens=None,
                                 mask_token=None):
    """One-time re-layout of module parameters into kernel-friendly form.

    conv_weight: (hidden, C, P, P) Conv2d weight   conv_bias: (hidden,)
    cls_token: (1, 1, hidden)      position_embeddings: (1, 1+G+num_patches, hidden)
    global_tokens: (1, G, hidden) or None          mask_token: (1, 1, hidden) or None
    """
    hidden, C, P, _ = conv_weight.shape
    K = C * P * P
    k_pad = _round_up(K, 128)
    n_pad = _round_up(hidden, 128)
    n_prefix = 1 + (0 if global_tokens is None else global_tokens.shape[1])

    # Projection weight to (K, N), (c, kh, kw) reduction order, bf16, padded.
    w = conv_weight.reshape(hidden, K).T
    w = jnp.pad(w, ((0, k_pad - K), (0, n_pad - hidden))).astype(jnp.bfloat16)
    b = jnp.pad(conv_bias.astype(jnp.float32), (0, n_pad - hidden)).reshape(1, n_pad)

    # Fold CLS/global prefix tokens into the position table: the kernel's
    # matmul contributes 0 for the zero prefix rows, the bias cancels, and the
    # kernel output is already the final [prefix | patch] embedding tensor.
    pos = position_embeddings[0].astype(jnp.float32)                # (total, hidden)
    prefix = cls_token.reshape(1, hidden).astype(jnp.float32)
    if global_tokens is not None:
        prefix = jnp.concatenate(
            [prefix, global_tokens.reshape(-1, hidden).astype(jnp.float32)], axis=0)
    pos_full = jnp.concatenate(
        [prefix + pos[:n_prefix] - conv_bias.astype(jnp.float32)[None, :],
         pos[n_prefix:]], axis=0)
    pos_full = jnp.pad(pos_full, ((0, 0), (0, n_pad - hidden)))     # (total, n_pad)

    if mask_token is None:
        mtok = jnp.zeros((1, n_pad), jnp.float32)
    else:
        mtok = jnp.pad(mask_token.reshape(1, hidden).astype(jnp.float32),
                       ((0, 0), (0, n_pad - hidden)))
    return dict(w=w, b=b, pos=pos_full, mask_token=mtok)


@functools.partial(
    jax.jit, static_argnames=("patch_size", "hidden_size", "num_prefix_tokens"))
def vit_embeddings_forward(pixel_values, params, bool_masked_pos=None, *,
                           patch_size, hidden_size, num_prefix_tokens):
    """Pallas implementation of ViTEmbeddings.forward (eval mode).

    pixel_values: (B, C, H, W) NCHW (PyTorch layout).
    Returns: (B, num_prefix_tokens + num_patches, hidden_size)
    """
    B, C, H, W = pixel_values.shape
    P = patch_size
    nH, nW = H // P, W // P
    S = nH * nW
    K = C * P * P
    n_prefix = num_prefix_tokens
    total_seq = n_prefix + S
    hidden = hidden_size

    w = params["w"]
    k_pad, n_pad = w.shape

    if not jnp.issubdtype(pixel_values.dtype, jnp.floating):
        pixel_values = pixel_values.astype(jnp.float32)   # never emit int embeddings
    out_dtype = pixel_values.dtype

    t_s, s_pad = _seq_tiling(total_seq, B)
    masked = bool_masked_pos is not None
    tn, footprint = _choose_tn(n_pad, k_pad, t_s, jnp.dtype(out_dtype).itemsize,
                               masked)
    s_blocks = s_pad // t_s
    n_blocks = n_pad // tn

    # --- im2col: cast to bf16 FIRST so the XLA transpose copy moves half the
    # bytes; prepend (1+G) zero rows for the prefix tokens (folded into pos).
    # TODO(synk): fuse this im2col gather into the kernel (manual DMA of NCHW
    # row-bands + on-chip relayout) to remove the remaining HBM round-trip.
    x = pixel_values.astype(jnp.bfloat16)
    x = x.reshape(B, C, nH, P, nW, P).transpose(0, 2, 4, 1, 3, 5).reshape(B, S, K)
    patches = jnp.pad(x, ((0, 0), (n_prefix, s_pad - total_seq), (0, k_pad - K)))

    pos = params["pos"]                                   # (total_seq, n_pad) f32
    if s_pad != total_seq:
        pos = jnp.pad(pos, ((0, s_pad - total_seq), (0, 0)))

    # --- grid ordering: the weight-varying axis (n) outermost only when it is
    # actually tiled; otherwise the largest independent axis outermost so v7x's
    # two TensorCores both get work; batch innermost so the weight / bias /
    # pos blocks keep a constant block index and are never re-fetched.
    if n_blocks > 1:
        order = ("n", "s", "b") if s_blocks >= B else ("n", "b", "s")
    elif s_blocks > 1:
        order = ("s", "b", "n")
    else:
        order = ("b", "s", "n")
    sizes = {"b": B, "s": s_blocks, "n": n_blocks}
    grid = tuple(sizes[a] for a in order)
    ax = {a: i for i, a in enumerate(order)}

    def _idx(*dims):
        def f(g0, g1, g2):
            g = (g0, g1, g2)
            return tuple(g[ax[d]] if isinstance(d, str) else 0 for d in dims)
        return f

    x_map, w_map, vec_map = _idx("b", "s", 0), _idx(0, "n"), _idx(0, "n")
    pos_map, out_map = _idx("s", "n"), _idx("b", "s", "n")

    in_specs = [
        pl.BlockSpec((1, t_s, k_pad), x_map),     # patches (streaming)
        pl.BlockSpec((k_pad, tn), w_map),         # weight  (resident)
        pl.BlockSpec((1, tn), vec_map),           # bias    (resident)
    ]
    args = [patches, w, params["b"]]
    if masked:
        kernel = _embed_kernel_masked
        mask = bool_masked_pos.astype(jnp.float32).reshape(B, S, 1)
        mask = jnp.pad(mask, ((0, 0), (n_prefix, s_pad - total_seq), (0, 0)))
        in_specs += [pl.BlockSpec((1, t_s, 1), x_map),     # mask
                     pl.BlockSpec((1, tn), vec_map)]       # mask token
        args += [mask, params["mask_token"]]
    else:
        kernel = _embed_kernel
    in_specs.append(pl.BlockSpec((t_s, tn), pos_map))      # pos (+ folded prefix)
    args.append(pos)

    cost = pl.CostEstimate(
        flops=2 * B * s_pad * k_pad * n_pad, transcendentals=0,
        bytes_accessed=(patches.size * 2 + w.size * 2 + pos.size * 4
                        + B * s_pad * n_pad * jnp.dtype(out_dtype).itemsize))

    # TODO(synk): for very large hidden/K on v7x, mark the grid-invariant
    # inputs with pipeline_mode=pl.Buffered(1) to halve their VMEM footprint.
    out = pl.pallas_call(
        kernel,
        out_shape=jax.ShapeDtypeStruct((B, s_pad, n_pad), out_dtype),
        grid=grid,
        in_specs=in_specs,
        out_specs=pl.BlockSpec((1, t_s, tn), out_map),
        compiler_params=pltpu.CompilerParams(
            dimension_semantics=("parallel", "parallel", "parallel"),
            vmem_limit_bytes=int(min(56 * 1024 * 1024,
                                     max(32 * 1024 * 1024, int(footprint * 1.25))))),
        cost_estimate=cost,
    )(*args)

    emb = out
    if s_pad != total_seq:
        emb = emb[:, :total_seq, :]
    if n_pad != hidden:
        emb = emb[:, :, :hidden]
    # TODO(synk): nn.Dropout is identity in eval mode; training-mode dropout
    # (pltpu.prng_*) and interpolate_pos_encoding are not implemented.
    return emb


if __name__ == "__main__":
    # Small config consistent with the module:
    #   image_size=16, patch_size=4, num_channels=4, hidden_size=32,
    #   num_global_tokens=2  ->  num_patches=16, seq_len = 1 + 2 + 16 = 19
    B, C, H, W = 2, 4, 16, 16
    P = 4
    HIDDEN = 32
    G = 2
    NUM_PATCHES = (H // P) * (W // P)
    N_PREFIX = 1 + G

    key = jax.random.PRNGKey(0)
    k_x, k_w, k_b, k_cls, k_glob, k_pos, k_m, k_mtok = jax.random.split(key, 8)

    pixel_values = jax.random.normal(k_x, (B, C, H, W), dtype=jnp.float32)
    conv_weight = 0.02 * jax.random.normal(k_w, (HIDDEN, C, P, P), dtype=jnp.float32)
    conv_bias = 0.01 * jax.random.normal(k_b, (HIDDEN,), dtype=jnp.float32)
    cls_token = jax.random.normal(k_cls, (1, 1, HIDDEN), dtype=jnp.float32)
    global_tokens = jax.random.normal(k_glob, (1, G, HIDDEN), dtype=jnp.float32)
    position_embeddings = jax.random.normal(
        k_pos, (1, N_PREFIX + NUM_PATCHES, HIDDEN), dtype=jnp.float32)
    mask_token = jax.random.normal(k_mtok, (1, 1, HIDDEN), dtype=jnp.float32)
    bool_masked_pos = jax.random.bernoulli(k_m, 0.3, (B, NUM_PATCHES))

    params = prepare_vit_embedding_params(
        conv_weight, conv_bias, cls_token, position_embeddings,
        global_tokens=global_tokens, mask_token=mask_token)

    out = vit_embeddings_forward(
        pixel_values, params, patch_size=P, hidden_size=HIDDEN,
        num_prefix_tokens=N_PREFIX)
    out = jax.block_until_ready(out)

    out_masked = vit_embeddings_forward(
        pixel_values, params, bool_masked_pos, patch_size=P, hidden_size=HIDDEN,
        num_prefix_tokens=N_PREFIX)
    out_masked = jax.block_until_ready(out_masked)

    # --- pure-JAX f32 reference: Conv2d(stride=P) -> flatten(2).transpose,
    #     optional mask-token replacement, concat CLS/global, add pos emb.
    conv = lax.conv_general_dilated(
        pixel_values, conv_weight, window_strides=(P, P), padding="VALID",
        dimension_numbers=("NCHW", "OIHW", "NCHW"),
    ) + conv_bias.reshape(1, HIDDEN, 1, 1)
    patch_ref = conv.reshape(B, HIDDEN, -1).transpose(0, 2, 1)
    prefix_ref = jnp.concatenate(
        [jnp.broadcast_to(cls_token, (B, 1, HIDDEN)),
         jnp.broadcast_to(global_tokens, (B, G, HIDDEN))], axis=1)
    ref = jnp.concatenate([prefix_ref, patch_ref], axis=1) + position_embeddings

    m = bool_masked_pos.astype(jnp.float32)[..., None]
    patch_masked = patch_ref * (1.0 - m) + mask_token * m
    ref_masked = (jnp.concatenate([prefix_ref, patch_masked], axis=1)
                  + position_embeddings)

    assert out.shape == (B, N_PREFIX + NUM_PATCHES, HIDDEN), out.shape
    assert out_masked.shape == (B, N_PREFIX + NUM_PATCHES, HIDDEN), out_masked.shape
    # bf16 operands feed the MXU -> compare vs f32 reference with loose tol.
    err0 = float(jnp.max(jnp.abs(out - ref)))
    err1 = float(jnp.max(jnp.abs(out_masked - ref_masked)))
    assert err0 < 3e-2 and err1 < 3e-2, (err0, err1)

    print("KERNEL_OK")
</pallas_src>

<mosaic_0001>
module attributes {stable_mosaic.version = 11 : i64} {
  func.func @_embed_kernel(%arg0: i32, %arg1: i32, %arg2: i32, %arg3: memref<1x19x128xbf16, #tpu.memory_space<vmem>>, %arg4: memref<128x128xbf16, #tpu.memory_space<vmem>>, %arg5: memref<1x128xf32, #tpu.memory_space<vmem>>, %arg6: memref<19x128xf32, #tpu.memory_space<vmem>>, %arg7: memref<1x19x128xf32, #tpu.memory_space<vmem>>) attributes {dimension_semantics = [#tpu.dimension_semantics<parallel>, #tpu.dimension_semantics<parallel>, #tpu.dimension_semantics<parallel>], iteration_bounds = array<i64: 2, 1, 1>, scalar_prefetch = 0 : i64, scratch_operands = 0 : i64, tpu.core_type = #tpu.core_type<tc>, window_params = [{transform_indices = @transform_0, window_bounds = array<i64: 1, 19, 128>}, {transform_indices = @transform_1, window_bounds = array<i64: 128, 128>}, {transform_indices = @transform_2, window_bounds = array<i64: 1, 128>}, {transform_indices = @transform_3, window_bounds = array<i64: 19, 128>}, {transform_indices = @transform_4, window_bounds = array<i64: 1, 19, 128>}]} {
    %c0 = arith.constant 0 : index
    %c0_0 = arith.constant 0 : index
    %c0_1 = arith.constant 0 : index
    %0 = vector.load %arg3[%c0, %c0_0, %c0_1] : memref<1x19x128xbf16, #tpu.memory_space<vmem>>, vector<1x19x128xbf16>
    %1 = vector.shape_cast %0 : vector<1x19x128xbf16> to vector<19x128xbf16>
    %c0_2 = arith.constant 0 : index
    %c0_3 = arith.constant 0 : index
    %2 = vector.load %arg4[%c0_2, %c0_3] : memref<128x128xbf16, #tpu.memory_space<vmem>>, vector<128x128xbf16>
    %cst = arith.constant dense<0.000000e+00> : vector<19x128xf32>
    %3 = tpu.matmul %1, %2, %cst {dimension_numbers = #tpu.dot_dimension_numbers<[1], [0], [0], [1], [0, 0, 1, 1], [], []>} : vector<19x128xbf16>, vector<128x128xbf16>, vector<19x128xf32> -> vector<19x128xf32>
    %c0_4 = arith.constant 0 : index
    %c0_5 = arith.constant 0 : index
    %4 = vector.load %arg5[%c0_4, %c0_5] : memref<1x128xf32, #tpu.memory_space<vmem>>, vector<1x128xf32>
    %5 = vector.broadcast %4 : vector<1x128xf32> to vector<19x128xf32>
    %6 = arith.addf %3, %5 : vector<19x128xf32>
    %c0_6 = arith.constant 0 : index
    %c0_7 = arith.constant 0 : index
    %7 = vector.load %arg6[%c0_6, %c0_7] : memref<19x128xf32, #tpu.memory_space<vmem>>, vector<19x128xf32>
    %8 = arith.addf %6, %7 : vector<19x128xf32>
    %c0_8 = arith.constant 0 : index
    %c0_9 = arith.constant 0 : index
    %c0_10 = arith.constant 0 : index
    %9 = vector.load %arg7[%c0_8, %c0_9, %c0_10] : memref<1x19x128xf32, #tpu.memory_space<vmem>>, vector<1x19x128xf32>
    %10 = vector.shape_cast %9 : vector<1x19x128xf32> to vector<19x128xf32>
    %11 = vector.shape_cast %8 : vector<19x128xf32> to vector<1x19x128xf32>
    tpu.vector_store %arg7[%c0_8, %c0_9, %c0_10], %11 {strides = array<i32>} : memref<1x19x128xf32, #tpu.memory_space<vmem>>, vector<1x19x128xf32>,
    return
  }
  func.func @transform_0(%arg0: i32, %arg1: i32, %arg2: i32) -> (i32, i32, i32) {
    %c0_i32 = arith.constant 0 : i32
    %c0_i32_0 = arith.constant 0 : i32
    return %arg0, %arg1, %c0_i32 : i32, i32, i32
  }
  func.func @transform_1(%arg0: i32, %arg1: i32, %arg2: i32) -> (i32, i32) {
    %c0_i32 = arith.constant 0 : i32
    %c0_i32_0 = arith.constant 0 : i32
    return %c0_i32, %arg2 : i32, i32
  }
  func.func @transform_2(%arg0: i32, %arg1: i32, %arg2: i32) -> (i32, i32) {
    %c0_i32 = arith.constant 0 : i32
    %c0_i32_0 = arith.constant 0 : i32
    return %c0_i32, %arg2 : i32, i32
  }
  func.func @transform_3(%arg0: i32, %arg1: i32, %arg2: i32) -> (i32, i32) {
    %c0_i32 = arith.constant 0 : i32
    return %arg1, %arg2 : i32, i32
  }
  func.func @transform_4(%arg0: i32, %arg1: i32, %arg2: i32) -> (i32, i32, i32) {
    %c0_i32 = arith.constant 0 : i32
    return %arg0, %arg1, %arg2 : i32, i32, i32
  }
}

</mosaic_0001>

<bundles_post_ra>
// kernel: vit_embeddings_forward.1
= control target key start
LH: loop header
LB: loop body
LE: loop exit
PB: predicated region body
PF: predicated region fallthrough
CT: control target
= control target key end

     0   :  { %s741_s15 = smov 0   ;;  %s743_s16 = smov 0   ;;  %s814_s0 = inlined_call_operand.vmem [shape: bf16[2,19,128], index: 0, kind: input, shape index: {}]   ;;  %s815_s1 = inlined_call_operand.vmem [shape: bf16[128,128], index: 1, kind: input, shape index: {}]   ;;  %s816_s2 = inlined_call_operand.vmem [shape: f32[1,128], index: 2, kind: input, shape index: {}]   ;;  %s817_s3 = inlined_call_operand.vmem [shape: f32[19,128], index: 3, kind: input, shape index: {}]   ;;  %s818_s4 = inlined_call_operand.vmem [shape: f32[2,19,128], index: 4, kind: output, shape index: {}]  }
   0x1   :  { %s745_s17 = smov 0  }
   0x2 LB: > { %s33_s18 = sadd.s32 1, %s710_s16  ;;  %p610_p0 = scmp.ge.s32.totalorder %s714_s17, 1  ;;  %s714_s17 = sphi %s745_s17, %s14_s17   ;;  %s710_s16 = sphi %s743_s16, %s820_s16   ;;  %s706_s15 = sphi %s741_s15, %s819_s15  }
   0x3   : > { %p35_p1 = scmp.ge.s32.totalorder %s33_s18, 2  ;;  %p225_p2 = scmp.lt.s32.totalorder %s714_s17, 3 }
   0x5   : > { %s822_s18 = smov (%p35_p1, %s33_s18), 0  ;;  %p226_p3 = pnand %p610_p0, %p225_p2 }
   0x6   : > { %p278_p4 = scmp.lt.s32.totalorder (!%p226_p3), %s706_s15, 1 }
   0x7   : > { %229 = sbr.rel (%p226_p3) target bundleno = 249 (0xf9), region = 36 }
   0xc   : > { %v682_v0 = vld [vmem:[%s815_s1 + $0x38] sm:$0xff]   ;;  %v683_v1 = vld [vmem:[%s815_s1 + $0x30] sm:$0xff]   ;;  %s824_s15 = smov (!%p278_p4, %s706_s15), 1  ;;  %v684_v2 = vld [vmem:[%s815_s1 + $0x28] sm:$0xff]  }
   0xd   : > { %636 = vmatprep.subr.bf16.mxu0 %v682_v0  ;;  %s656_s25 = smul.u32 12, %s824_s15  ;;  %v685_v3 = vld [vmem:[%s815_s1 + $0x20] sm:$0xff]   ;;  %v686_v5 = vld [vmem:[%s815_s1 + $0x18] sm:$0xff]   ;;  %v687_v6 = vld [vmem:[%s815_s1 + $0x10] sm:$0xff]  }
   0xe   : > { %637 = vmatpush3.bf16.msra.mxu0 %v682_v0  ;;  %v688_v7 = vld [vmem:[%s815_s1 + $0x8] sm:$0xff]   ;;  %v689_v8 = vld [vmem:[%s815_s1] sm:$0xff]   ;;  %s657_s13 = smul.u32 24, %s824_s15  ;;  %v451_v12 = vld [vmem:[%s817_s3 + $0x10] sm:$0x7] }
   0xf   : > { %638 = vmatprep.subr.bf16.mxu0 %v683_v1  ;;  %s285_s28 = scalar_lea.vmem %s814_s0, %s656_s25  ;;  %v613_v10 = vld [vmem:[%s816_s2] ss:$0 sm:$0xff]  ;;  %v450_v21 = vld [vmem:[%s817_s3 + $0x8] sm:$0xff] }
  0x10   : > { %v690_v4 = vld [vmem:[%s285_s28] sm:$0xff]   ;;  %v691_v9 = vld [vmem:[%s285_s28 + $0x8] ss:$0 sps:$4 sm:$0x33]   ;;  %s314_s24 = scalar_lea.vmem %s818_s4, %s657_s13 }
  0x11   : > { %652 = vmatprep.mubr.bf16.mxu0 %v690_v4  ;;  %v449_v15 = vld [vmem:[%s817_s3] sm:$0xff] }
  0x12   : > { %639 = vmatpush3.bf16.msra.mxu0 %v683_v1 }
  0x13   : > { %640 = vmatprep.subr.bf16.mxu0 %v684_v2 }
  0x16   : > { %641 = vmatpush3.bf16.msra.mxu0 %v684_v2 }
  0x17   : > { %642 = vmatprep.subr.bf16.mxu0 %v685_v3 }
  0x1a   : > { %643 = vmatpush3.bf16.msra.mxu0 %v685_v3 }
  0x1b   : > { %644 = vmatprep.subr.bf16.mxu0 %v686_v5 }
  0x1e   : > { %645 = vmatpush3.bf16.msra.mxu0 %v686_v5 }
  0x1f   : > { %646 = vmatprep.subr.bf16.mxu0 %v687_v6 }
  0x22   : > { %647 = vmatpush3.bf16.msra.mxu0 %v687_v6 }
  0x23   : > { %648 = vmatprep.subr.bf16.mxu0 %v688_v7 }
  0x26   : > { %649 = vmatpush3.bf16.msra.mxu0 %v688_v7 }
  0x27   : > { %650 = vmatprep.subr.bf16.mxu0 %v689_v8 }
  0x2a   : > { %651 = vmatpush3.bf16.msra.mxu0 %v689_v8 }
  0x2d   : > { %653 = vmatmul.mubr.bf16.vlgmr.msra.gmra.mxu0 %v691_v9 }
  0xed   : > { %v654_v11 = vpop.f32.mrf.mxu0 }
  0xee   : > { %v444_v13 = vadd.f32 %v654_v11, %v613_v10 }
  0xef   : > { %v435_v14 = vpop.f32.mrf.mxu0 }
  0xf0   : > { %v454_v16 = vadd.f32 %v451_v12, %v444_v13  ;;  %v436_v17 = vadd.f32 %v613_v10, %v435_v14 }
  0xf1   : > { %v655_v18 = vpop.f32.mrf.mxu0 }
  0xf2   : > { %457 = vst [vmem:[%s314_s24 + $0x10] sm:$0x7] %v454_v16  ;;  %v452_v19 = vadd.f32 %v449_v15, %v436_v17 }
  0xf3   : > { %v438_v20 = vpop.f32.mrf.mxu0 }
  0xf4   : > { %455 = vst [vmem:[%s314_s24] sm:$0xff] %v452_v19  ;;  %v439_v22 = vadd.f32 %v613_v10, %v438_v20 }
  0xf6   : > { %v453_v23 = vadd.f32 %v450_v21, %v439_v22 }
  0xf8   : > { %456 = vst [vmem:[%s314_s24 + $0x8] sm:$0xff] %v453_v23 }
  0xf9 PF: > { %s14_s17 = sadd.s32 1, %s714_s17   ;;  %s819_s15 = smov %s710_s16 }
  0xfa   : > { %p11_p5 = scmp.ge.s32.totalorder %s14_s17, 4   ;;  %s820_s16 = smov %s822_s18 }
  0xfc   :  { %13 = sbr.rel (!%p11_p5) target bundleno = 2 (0x2), region = 75 }

</bundles_post_ra>
